<compile_context>
chip_gen: v7x
topology: tpu7x:2x2x1
jax: 0.10.0
libtpu: 0.0.40
codegen_flags: <defaults>
</compile_context>

<pallas_src>
import functools

import jax
import jax.numpy as jnp
from jax import lax
from jax.experimental import pallas as pl
from jax.experimental.pallas import tpu as pltpu


def _round_up(x, m):
    return ((x + m - 1) // m) * m


_MAX_TILE_E = 2048          # codebook rows streamed per inner ("arbitrary") grid step
_MAX_TILE_N = 1024          # upper bound on the flattened-input tile
_PAD_DIST = 1e30            # sentinel 0.5*||e||^2 for padded codebook rows (never wins)
_PALLAS_MIN_WORK = 1_000_000  # below N*E*D ~1e6 plain XLA beats kernel launch overhead


def _vmem_limit_bytes():
    """Per-generation scoped-VMEM budget.

    v5e/v6e have 128 MiB VMEM (default scoped limit is only 16/32 MiB), v7x has
    64 MiB per TensorCore.  Query the hardware when possible; otherwise assume
    the smallest (v7x) so tiles never silently spill.
    """
    cap = None
    try:
        info = pltpu.get_tpu_info()
        for name in ("vmem_capacity_bytes", "vmem_size_bytes", "vmem_bytes"):
            cap = getattr(info, name, None)
            if cap:
                break
    except Exception:
        cap = None
    if not cap:
        cap = 64 * 1024 * 1024
    return int(min(cap * 3 // 4, 96 * 1024 * 1024))


def _vq_kernel(x_ref, e_ref, esq_ref, q_ref, idx_ref,
               min_sc, idx_sc, q_sc, *, matmul_dtype, precision):
    """One (tile_n, D) input tile vs. one (tile_e, D) codebook tile.

    Grid is (N tiles [parallel], E tiles [arbitrary]).  Running minimum,
    argmin and best codebook row are carried across the E axis in VMEM
    scratch; outputs are written on the last E step.
    """
    e_step = pl.program_id(1)

    @pl.when(e_step == 0)
    def _():
        min_sc[...] = jnp.full_like(min_sc, jnp.inf)
        idx_sc[...] = jnp.zeros_like(idx_sc)
        q_sc[...] = jnp.zeros_like(q_sc)

    x = x_ref[...]                                   # (TN, D) f32
    e = e_ref[...]                                   # (TE, D) f32

    # score = x . e^T on the MXU (contract on D, no explicit transpose).
    # ||x||^2 is a per-row constant and is dropped; the factor of 2 is folded
    # so we minimize 0.5*||e||^2 - x.e^T (same argmin as the full distance).
    score = lax.dot_general(
        x.astype(matmul_dtype), e.astype(matmul_dtype),
        dimension_numbers=(((1,), (1,)), ((), ())),
        preferred_element_type=jnp.float32,
        precision=precision)                         # (TN, TE)

    dist = esq_ref[...] - score                      # (TN, TE)

    # First-minimum argmin within this E tile (matches torch.argmin ties).
    tile_e = dist.shape[1]
    iota = lax.broadcasted_iota(jnp.int32, dist.shape, 1)
    local_min = jnp.min(dist, axis=1, keepdims=True)                  # (TN, 1)
    local_idx = jnp.min(jnp.where(dist == local_min, iota, tile_e),
                        axis=1, keepdims=True)                        # (TN, 1)

    # Exact codebook row for the local winner: one-hot @ e on the MXU with
    # HIGHEST precision (0/1 one-hot + 3x-bf16 split => bit-exact rows).
    onehot = (iota == local_idx).astype(jnp.float32)
    local_q = lax.dot_general(
        onehot, e, dimension_numbers=(((1,), (0,)), ((), ())),
        preferred_element_type=jnp.float32,
        precision=lax.Precision.HIGHEST)                              # (TN, D)

    # Cross-tile update.  Strict "<" keeps the earlier E tile on exact ties,
    # matching torch.argmin's first-minimum behaviour.
    improved = local_min < min_sc[...]
    min_sc[...] = jnp.where(improved, local_min, min_sc[...])
    idx_sc[...] = jnp.where(improved, local_idx + e_step * tile_e, idx_sc[...])
    q_sc[...] = jnp.where(improved, local_q, q_sc[...])

    @pl.when(e_step == pl.num_programs(1) - 1)
    def _():
        q_ref[...] = q_sc[...]
        idx_ref[...] = idx_sc[...]


def _vq_pallas(flat_input, embedding, *, tile_n=None, matmul_dtype=jnp.float32):
    """Nearest-codeword search + lookup for flattened (N, D) inputs.

    Returns (quantized_flat (N, D) f32, indices (N,) int32).
    """
    N, D = flat_input.shape
    E = embedding.shape[0]

    vmem_limit = _vmem_limit_bytes()

    # ---- E tiling: keep the codebook resident when small, stream otherwise.
    tile_e = E if E <= _MAX_TILE_E else _MAX_TILE_E        # multiple of 128 if < E
    e_pad = _round_up(E, tile_e)
    emb = embedding
    e_half_sq = 0.5 * jnp.sum(embedding * embedding, axis=1)   # hoisted once
    if e_pad != E:
        emb = jnp.pad(embedding, ((0, e_pad - E), (0, 0)))
        e_half_sq = jnp.pad(e_half_sq, (0, e_pad - E), constant_values=_PAD_DIST)
    e_half_sq = e_half_sq[None, :]                              # (1, e_pad)
    num_e_steps = e_pad // tile_e

    # ---- tile_n sizing against the VMEM budget (double-buffered x/q tiles,
    #      single/double-buffered codebook, ~3 live (TN, TE) f32 intermediates,
    #      plus the (TN, D) best-row scratch).
    if tile_n is None:
        budget = int(vmem_limit * 0.6)                          # headroom
        cb_bufs = 1 if num_e_steps == 1 else 2
        fixed = (tile_e * D + tile_e) * 4 * cb_bufs
        per_row = (2 * D + 2 * D + D + 3 * tile_e) * 4 + 16
        tile_n = max((budget - fixed) // max(per_row, 1), 8)
    tile_n = max(8, (int(tile_n) // 8) * 8)
    cap_data = _round_up(max(N, 1), 8)                          # no bigger than data
    cap_two_steps = max(8, _round_up(pl.cdiv(max(N, 1), 2), 8))  # >=2 steps (v7x megacore)
    tile_n = min(tile_n, _MAX_TILE_N, cap_data, cap_two_steps)

    n_pad = _round_up(max(N, 1), tile_n)
    if n_pad != N:
        flat_input = jnp.pad(flat_input, ((0, n_pad - N), (0, 0)))

    grid = (n_pad // tile_n, num_e_steps)

    # Single-buffer the constant-index codebook + ||e||^2 specs when resident;
    # keep default double-buffering when the E axis actually streams.
    if num_e_steps == 1:
        cb_spec = pl.BlockSpec((tile_e, D), lambda i, j: (j, 0),
                               pipeline_mode=pl.Buffered(1))
        esq_spec = pl.BlockSpec((1, tile_e), lambda i, j: (0, j),
                                pipeline_mode=pl.Buffered(1))
    else:
        cb_spec = pl.BlockSpec((tile_e, D), lambda i, j: (j, 0))
        esq_spec = pl.BlockSpec((1, tile_e), lambda i, j: (0, j))

    precision = (lax.Precision.HIGHEST
                 if jnp.dtype(matmul_dtype) == jnp.dtype(jnp.float32)
                 else lax.Precision.DEFAULT)
    kernel = functools.partial(_vq_kernel, matmul_dtype=matmul_dtype,
                               precision=precision)

    q_flat, idx = pl.pallas_call(
        kernel,
        out_shape=(
            jax.ShapeDtypeStruct((n_pad, D), jnp.float32),
            jax.ShapeDtypeStruct((n_pad, 1), jnp.int32),
        ),
        grid_spec=pltpu.PrefetchScalarGridSpec(
            num_scalar_prefetch=0,
            grid=grid,
            in_specs=[
                pl.BlockSpec((tile_n, D), lambda i, j: (i, 0)),   # inputs tile
                cb_spec,                                          # codebook tile
                esq_spec,                                         # 0.5*||e||^2 tile
            ],
            out_specs=[
                pl.BlockSpec((tile_n, D), lambda i, j: (i, 0)),   # quantized tile
                pl.BlockSpec((tile_n, 1), lambda i, j: (i, 0)),   # indices tile
            ],
            scratch_shapes=[
                pltpu.VMEM((tile_n, 1), jnp.float32),   # running min
                pltpu.VMEM((tile_n, 1), jnp.int32),     # running argmin
                pltpu.VMEM((tile_n, D), jnp.float32),   # running best codebook row
            ],
        ),
        compiler_params=pltpu.CompilerParams(
            dimension_semantics=("parallel", "arbitrary"),
            vmem_limit_bytes=vmem_limit,
        ),
    )(flat_input, emb, e_half_sq)

    return q_flat[:N], idx[:N, 0]


def _vq_xla(flat_input, embedding):
    """Plain-XLA fallback for tiny problems (kernel launch overhead dominates)."""
    d = (jnp.sum(flat_input ** 2, axis=1, keepdims=True)
         + jnp.sum(embedding ** 2, axis=1)[None, :]
         - 2.0 * jnp.matmul(flat_input, embedding.T,
                            precision=lax.Precision.HIGHEST))
    idx = jnp.argmin(d, axis=1).astype(jnp.int32)
    return jnp.take(embedding, idx, axis=0), idx


def vector_quantizer_forward(inputs, embedding, commitment_cost,
                             fine_tuning=False, n=None, tile_n=None,
                             matmul_dtype=jnp.float32, use_kernel=None):
    """Forward pass of Vector_Quantizer (matches the PyTorch module).

    inputs    : (B, K, D) float32
    embedding : (E, D)    float32 codebook
    Returns (loss, quantized, encodings).
    """
    input_shape = inputs.shape
    E, D = embedding.shape
    flat_input = inputs.reshape(-1, D).astype(jnp.float32)
    emb = embedding.astype(jnp.float32)
    N = flat_input.shape[0]

    if use_kernel is None:
        use_kernel = (N * E * D) >= _PALLAS_MIN_WORK
    if use_kernel:
        q_flat, idx = _vq_pallas(flat_input, emb, tile_n=tile_n,
                                 matmul_dtype=matmul_dtype)
    else:
        q_flat, idx = _vq_xla(flat_input, emb)

    # Rebuild the (N, E) one-hot encodings from indices (E x less encoding
    # write bandwidth inside the kernel).
    encodings = (idx[:, None] == jnp.arange(E, dtype=jnp.int32)[None, :]
                 ).astype(jnp.float32)

    quantized = q_flat.reshape(input_shape)

    if fine_tuning:
        # quantized[i, n[i]:K, :] = 0  (vectorized mask instead of Python loop)
        K = input_shape[1]
        n_arr = jnp.asarray(n, dtype=jnp.int32)                          # (B,)
        pos = jnp.arange(K, dtype=jnp.int32)                             # (K,)
        keep = (pos[None, :] < n_arr[:, None]).astype(quantized.dtype)   # (B, K)
        quantized = quantized * keep[:, :, None]

    # e_latent = mse(quantized.detach(), inputs); q_latent = mse(quantized, inputs.detach())
    e_latent_loss = jnp.mean((jax.lax.stop_gradient(quantized) - inputs) ** 2)
    q_latent_loss = jnp.mean((quantized - jax.lax.stop_gradient(inputs)) ** 2)
    loss = q_latent_loss + commitment_cost * e_latent_loss

    # Straight-through estimator.
    quantized_st = inputs + jax.lax.stop_gradient(quantized - inputs)

    return loss, quantized_st, encodings


def _reference_forward(inputs, embedding, commitment_cost, fine_tuning, n):
    """Pure-JAX reference mirroring the PyTorch forward (values only)."""
    input_shape = inputs.shape
    E, D = embedding.shape
    flat = inputs.reshape(-1, D)
    d = (jnp.sum(flat ** 2, axis=1, keepdims=True)
         + jnp.sum(embedding ** 2, axis=1)[None, :]
         - 2.0 * jnp.matmul(flat, embedding.T, precision=lax.Precision.HIGHEST))
    idx = jnp.argmin(d, axis=1)
    enc = jax.nn.one_hot(idx, E, dtype=jnp.float32)
    q = jnp.take(embedding, idx, axis=0).reshape(input_shape)
    if fine_tuning:
        K = input_shape[1]
        n_arr = jnp.asarray(n, dtype=jnp.int32)
        keep = (jnp.arange(K, dtype=jnp.int32)[None, :] < n_arr[:, None]
                ).astype(q.dtype)
        q = q * keep[:, :, None]
    e_l = jnp.mean((q - inputs) ** 2)
    q_l = jnp.mean((q - inputs) ** 2)
    loss = q_l + commitment_cost * e_l
    q_st = inputs + (q - inputs)
    return loss, q_st, enc


if __name__ == "__main__":
    # Module hyper-parameters (deterministic synthetic init).
    num_embeddings = 16
    embedding_dim = 32
    commitment_cost = 0.25

    key = jax.random.PRNGKey(0)
    k_emb, k_assign, k_noise = jax.random.split(key, 3)

    # nn.Embedding weight ~ U(-1/num_embeddings, 1/num_embeddings)
    embedding = jax.random.uniform(
        k_emb, (num_embeddings, embedding_dim),
        minval=-1.0 / num_embeddings, maxval=1.0 / num_embeddings,
        dtype=jnp.float32)

    # inputs: (B, K, D) = (2, 8, 32), built as perturbed codebook rows so the
    # nearest-codeword margins are large (deterministic argmin under both the
    # f32 and bf16 distance paths).
    B, K = 2, 8
    assign = jax.random.randint(k_assign, (B * K,), 0, num_embeddings)
    noise = 0.01 * jax.random.normal(k_noise, (B * K, embedding_dim),
                                     dtype=jnp.float32)
    inputs = (jnp.take(embedding, assign, axis=0) + noise
              ).reshape(B, K, embedding_dim)

    fine_tuning = True
    n = (5, 8)  # zero out positions n[i]..K-1 per batch element

    # Force the Pallas path (the auto-dispatch would pick plain XLA for a
    # problem this tiny).
    fwd = jax.jit(functools.partial(
        vector_quantizer_forward,
        commitment_cost=commitment_cost,
        fine_tuning=fine_tuning, n=n,
        use_kernel=True))

    loss, quantized, encodings = fwd(inputs, embedding)
    jax.block_until_ready((loss, quantized, encodings))

    # Shape / structure checks.
    assert loss.shape == ()
    assert quantized.shape == (B, K, embedding_dim)
    assert encodings.shape == (B * K, num_embeddings)
    assert bool(jnp.all(jnp.sum(encodings, axis=1) == 1.0))

    # Numerical check against a pure-JAX reference of the PyTorch forward.
    ref_loss, ref_q, ref_enc = _reference_forward(
        inputs, embedding, commitment_cost, fine_tuning, n)
    assert bool(jnp.allclose(loss, ref_loss, rtol=1e-5, atol=1e-5))
    assert bool(jnp.allclose(quantized, ref_q, rtol=1e-5, atol=1e-5))
    assert bool(jnp.allclose(encodings, ref_enc))

    # Also exercise the recommended bf16 distance-matmul path (the exact
    # one-hot @ codebook lookup stays f32, so values still match).
    fwd_bf16 = jax.jit(functools.partial(
        vector_quantizer_forward,
        commitment_cost=commitment_cost,
        fine_tuning=fine_tuning, n=n,
        use_kernel=True, matmul_dtype=jnp.bfloat16))
    loss_b, quantized_b, encodings_b = fwd_bf16(inputs, embedding)
    jax.block_until_ready((loss_b, quantized_b, encodings_b))
    assert bool(jnp.allclose(loss_b, ref_loss, rtol=1e-5, atol=1e-5))
    assert bool(jnp.allclose(quantized_b, ref_q, rtol=1e-5, atol=1e-5))
    assert bool(jnp.allclose(encodings_b, ref_enc))

    print("KERNEL_OK")
</pallas_src>

<mosaic_0001>
module attributes {stable_mosaic.version = 11 : i64} {
  func.func @_vq_kernel(%arg0: i32, %arg1: i32, %arg2: memref<8x32xf32, #tpu.memory_space<vmem>>, %arg3: memref<16x32xf32, #tpu.memory_space<vmem>>, %arg4: memref<1x16xf32, #tpu.memory_space<vmem>>, %arg5: memref<8x32xf32, #tpu.memory_space<vmem>>, %arg6: memref<8x1xi32, #tpu.memory_space<vmem>>, %arg7: memref<8x1xf32, #tpu.memory_space<vmem>>, %arg8: memref<8x1xi32, #tpu.memory_space<vmem>>, %arg9: memref<8x32xf32, #tpu.memory_space<vmem>>) attributes {dimension_semantics = [#tpu.dimension_semantics<parallel>, #tpu.dimension_semantics<arbitrary>], iteration_bounds = array<i64: 2, 1>, scalar_prefetch = 0 : i64, scratch_operands = 3 : i64, tpu.core_type = #tpu.core_type<tc>, window_params = [{transform_indices = @transform_0, window_bounds = array<i64: 8, 32>}, {pipeline_mode = #tpu.pipeline_mode<synchronous>, transform_indices = @transform_1, window_bounds = array<i64: 16, 32>}, {pipeline_mode = #tpu.pipeline_mode<synchronous>, transform_indices = @transform_2, window_bounds = array<i64: 1, 16>}, {transform_indices = @transform_3, window_bounds = array<i64: 8, 32>}, {transform_indices = @transform_4, window_bounds = array<i64: 8, 1>}]} {
    %c0_i32 = arith.constant 0 : i32
    %0 = arith.cmpi eq, %arg1, %c0_i32 : i32
    %1 = arith.extui %0 : i1 to i32
    %c0_i32_0 = arith.constant 0 : i32
    %2 = arith.cmpi ne, %1, %c0_i32_0 : i32
    scf.if %2 {
      %cst_26 = arith.constant 0x7F800000 : f32
      %42 = vector.broadcast %cst_26 : f32 to vector<8x1xf32>
      %c0_27 = arith.constant 0 : index
      %c0_28 = arith.constant 0 : index
      %43 = vector.load %arg7[%c0_27, %c0_28] : memref<8x1xf32, #tpu.memory_space<vmem>>, vector<8x1xf32>
      tpu.vector_store %arg7[%c0_27, %c0_28], %42 {strides = array<i32>} : memref<8x1xf32, #tpu.memory_space<vmem>>, vector<8x1xf32>,
      %c0_i32_29 = arith.constant 0 : i32
      %44 = vector.broadcast %c0_i32_29 : i32 to vector<8x1xi32>
      %c0_30 = arith.constant 0 : index
      %c0_31 = arith.constant 0 : index
      %45 = vector.load %arg8[%c0_30, %c0_31] : memref<8x1xi32, #tpu.memory_space<vmem>>, vector<8x1xi32>
      tpu.vector_store %arg8[%c0_30, %c0_31], %44 {strides = array<i32>} : memref<8x1xi32, #tpu.memory_space<vmem>>, vector<8x1xi32>,
      %cst_32 = arith.constant 0.000000e+00 : f32
      %46 = vector.broadcast %cst_32 : f32 to vector<8x32xf32>
      %c0_33 = arith.constant 0 : index
      %c0_34 = arith.constant 0 : index
      %47 = vector.load %arg9[%c0_33, %c0_34] : memref<8x32xf32, #tpu.memory_space<vmem>>, vector<8x32xf32>
      tpu.vector_store %arg9[%c0_33, %c0_34], %46 {strides = array<i32>} : memref<8x32xf32, #tpu.memory_space<vmem>>, vector<8x32xf32>,
    } else {
    }
    %c0 = arith.constant 0 : index
    %c0_1 = arith.constant 0 : index
    %3 = vector.load %arg2[%c0, %c0_1] : memref<8x32xf32, #tpu.memory_space<vmem>>, vector<8x32xf32>
    %c0_2 = arith.constant 0 : index
    %c0_3 = arith.constant 0 : index
    %4 = vector.load %arg3[%c0_2, %c0_3] : memref<16x32xf32, #tpu.memory_space<vmem>>, vector<16x32xf32>
    %cst = arith.constant dense<0.000000e+00> : vector<8x16xf32>
    %5 = tpu.matmul %3, %4, %cst {dimension_numbers = #tpu.dot_dimension_numbers<[1], [1], [0], [0], [0, 0, 1, 0], [], []>, precision = #tpu.contract_precision<fp32>} : vector<8x32xf32>, vector<16x32xf32>, vector<8x16xf32> -> vector<8x16xf32>
    %c0_4 = arith.constant 0 : index
    %c0_5 = arith.constant 0 : index
    %6 = vector.load %arg4[%c0_4, %c0_5] : memref<1x16xf32, #tpu.memory_space<vmem>>, vector<1x16xf32>
    %7 = vector.broadcast %6 : vector<1x16xf32> to vector<8x16xf32>
    %8 = arith.subf %7, %5 : vector<8x16xf32>
    %9 = tpu.iota {dimensions = array<i32: 1>} : vector<8x16xi32>
    %cst_6 = arith.constant dense<0x7F800000> : vector<8xf32>
    %10 = vector.multi_reduction <minimumf>, %8, %cst_6 [1] : vector<8x16xf32> to vector<8xf32>
    %11 = vector.shape_cast %10 : vector<8xf32> to vector<8x1xf32>
    %12 = vector.broadcast %11 : vector<8x1xf32> to vector<8x16xf32>
    %13 = arith.cmpf oeq, %8, %12 : vector<8x16xf32>
    %c16_i32 = arith.constant 16 : i32
    %14 = vector.broadcast %c16_i32 : i32 to vector<8x16xi32>
    %15 = arith.select %13, %9, %14 : vector<8x16xi1>, vector<8x16xi32>
    %cst_7 = arith.constant dense<2147483647> : vector<8xi32>
    %16 = vector.multi_reduction <minsi>, %15, %cst_7 [1] : vector<8x16xi32> to vector<8xi32>
    %17 = vector.shape_cast %16 : vector<8xi32> to vector<8x1xi32>
    %18 = vector.broadcast %17 : vector<8x1xi32> to vector<8x16xi32>
    %19 = arith.cmpi eq, %9, %18 : vector<8x16xi32>
    %20 = arith.extui %19 : vector<8x16xi1> to vector<8x16xi32>
    %21 = arith.sitofp %20 : vector<8x16xi32> to vector<8x16xf32>
    %cst_8 = arith.constant dense<0.000000e+00> : vector<8x32xf32>
    %22 = tpu.matmul %21, %4, %cst_8 {dimension_numbers = #tpu.dot_dimension_numbers<[1], [0], [0], [1], [0, 0, 1, 1], [], []>, precision = #tpu.contract_precision<fp32>} : vector<8x16xf32>, vector<16x32xf32>, vector<8x32xf32> -> vector<8x32xf32>
    %c0_9 = arith.constant 0 : index
    %c0_10 = arith.constant 0 : index
    %23 = vector.load %arg7[%c0_9, %c0_10] : memref<8x1xf32, #tpu.memory_space<vmem>>, vector<8x1xf32>
    %24 = arith.cmpf olt, %11, %23 : vector<8x1xf32>
    %c0_11 = arith.constant 0 : index
    %c0_12 = arith.constant 0 : index
    %25 = vector.load %arg7[%c0_11, %c0_12] : memref<8x1xf32, #tpu.memory_space<vmem>>, vector<8x1xf32>
    %26 = arith.select %24, %11, %25 : vector<8x1xi1>, vector<8x1xf32>
    %c0_13 = arith.constant 0 : index
    %c0_14 = arith.constant 0 : index
    %27 = vector.load %arg7[%c0_13, %c0_14] : memref<8x1xf32, #tpu.memory_space<vmem>>, vector<8x1xf32>
    tpu.vector_store %arg7[%c0_13, %c0_14], %26 {strides = array<i32>} : memref<8x1xf32, #tpu.memory_space<vmem>>, vector<8x1xf32>,
    %c16_i32_15 = arith.constant 16 : i32
    %28 = arith.muli %arg1, %c16_i32_15 : i32
    %29 = vector.broadcast %28 : i32 to vector<8x1xi32>
    %30 = arith.addi %17, %29 : vector<8x1xi32>
    %c0_16 = arith.constant 0 : index
    %c0_17 = arith.constant 0 : index
    %31 = vector.load %arg8[%c0_16, %c0_17] : memref<8x1xi32, #tpu.memory_space<vmem>>, vector<8x1xi32>
    %32 = arith.select %24, %30, %31 : vector<8x1xi1>, vector<8x1xi32>
    %c0_18 = arith.constant 0 : index
    %c0_19 = arith.constant 0 : index
    %33 = vector.load %arg8[%c0_18, %c0_19] : memref<8x1xi32, #tpu.memory_space<vmem>>, vector<8x1xi32>
    tpu.vector_store %arg8[%c0_18, %c0_19], %32 {strides = array<i32>} : memref<8x1xi32, #tpu.memory_space<vmem>>, vector<8x1xi32>,
    %c0_20 = arith.constant 0 : index
    %c0_21 = arith.constant 0 : index
    %34 = vector.load %arg9[%c0_20, %c0_21] : memref<8x32xf32, #tpu.memory_space<vmem>>, vector<8x32xf32>
    %35 = vector.shape_cast %24 : vector<8x1xi1> to vector<8x1xi1>
    %36 = vector.broadcast %35 : vector<8x1xi1> to vector<8x32xi1>
    %37 = arith.select %36, %22, %34 : vector<8x32xi1>, vector<8x32xf32>
    %c0_22 = arith.constant 0 : index
    %c0_23 = arith.constant 0 : index
    %38 = vector.load %arg9[%c0_22, %c0_23] : memref<8x32xf32, #tpu.memory_space<vmem>>, vector<8x32xf32>
    tpu.vector_store %arg9[%c0_22, %c0_23], %37 {strides = array<i32>} : memref<8x32xf32, #tpu.memory_space<vmem>>, vector<8x32xf32>,
    %c0_i32_24 = arith.constant 0 : i32
    %39 = arith.cmpi eq, %arg1, %c0_i32_24 : i32
    %40 = arith.extui %39 : i1 to i32
    %c0_i32_25 = arith.constant 0 : i32
    %41 = arith.cmpi ne, %40, %c0_i32_25 : i32
    scf.if %41 {
      %c0_26 = arith.constant 0 : index
      %c0_27 = arith.constant 0 : index
      %42 = vector.load %arg9[%c0_26, %c0_27] : memref<8x32xf32, #tpu.memory_space<vmem>>, vector<8x32xf32>
      %c0_28 = arith.constant 0 : index
      %c0_29 = arith.constant 0 : index
      %43 = vector.load %arg5[%c0_28, %c0_29] : memref<8x32xf32, #tpu.memory_space<vmem>>, vector<8x32xf32>
      tpu.vector_store %arg5[%c0_28, %c0_29], %42 {strides = array<i32>} : memref<8x32xf32, #tpu.memory_space<vmem>>, vector<8x32xf32>,
      %c0_30 = arith.constant 0 : index
      %c0_31 = arith.constant 0 : index
      %44 = vector.load %arg8[%c0_30, %c0_31] : memref<8x1xi32, #tpu.memory_space<vmem>>, vector<8x1xi32>
      %c0_32 = arith.constant 0 : index
      %c0_33 = arith.constant 0 : index
      %45 = vector.load %arg6[%c0_32, %c0_33] : memref<8x1xi32, #tpu.memory_space<vmem>>, vector<8x1xi32>
      tpu.vector_store %arg6[%c0_32, %c0_33], %44 {strides = array<i32>} : memref<8x1xi32, #tpu.memory_space<vmem>>, vector<8x1xi32>,
    } else {
    }
    return
  }
  func.func @transform_0(%arg0: i32, %arg1: i32) -> (i32, i32) {
    %c0_i32 = arith.constant 0 : i32
    %c0_i32_0 = arith.constant 0 : i32
    return %arg0, %c0_i32 : i32, i32
  }
  func.func @transform_1(%arg0: i32, %arg1: i32) -> (i32, i32) {
    %c0_i32 = arith.constant 0 : i32
    %c0_i32_0 = arith.constant 0 : i32
    return %arg1, %c0_i32 : i32, i32
  }
  func.func @transform_2(%arg0: i32, %arg1: i32) -> (i32, i32) {
    %c0_i32 = arith.constant 0 : i32
    %c0_i32_0 = arith.constant 0 : i32
    return %c0_i32, %arg1 : i32, i32
  }
  func.func @transform_3(%arg0: i32, %arg1: i32) -> (i32, i32) {
    %c0_i32 = arith.constant 0 : i32
    %c0_i32_0 = arith.constant 0 : i32
    return %arg0, %c0_i32 : i32, i32
  }
  func.func @transform_4(%arg0: i32, %arg1: i32) -> (i32, i32) {
    %c0_i32 = arith.constant 0 : i32
    %c0_i32_0 = arith.constant 0 : i32
    return %arg0, %c0_i32 : i32, i32
  }
}

</mosaic_0001>

<bundles_post_ra>
// kernel: vector_quantizer_forward.1
= control target key start
LH: loop header
LB: loop body
LE: loop exit
PB: predicated region body
PF: predicated region fallthrough
CT: control target
= control target key end

     0   :  { %10 = vsyncpa [#allocation6], 0  ;;  %s1702_s15 = smov 0   ;;  %s1704_s16 = smov 0   ;;  %s1857_s0 = inlined_call_operand.vmem [shape: f32[16,32], index: 0, kind: input, shape index: {}]   ;;  %s1858_s1 = inlined_call_operand.hbm [shape: f32[16,32], index: 1, kind: input, shape index: {}]   ;;  %s1859_s2 = inlined_call_operand.vmem [shape: f32[1,16], index: 2, kind: input, shape index: {}]   ;;  %s1860_s3 = inlined_call_operand.vmem [shape: f32[16,32], index: 3, kind: output, shape index: {0}]   ;;  %s1861_s4 = inlined_call_operand.vmem [shape: s32[16,1], index: 4, kind: output, shape index: {1}]  }
   0x1   :  { %s1706_s17 = smov 0  }
   0x2 LB: > { %s1376_s18 = sadd.s32 4294967295, %s1667_s17   ;;  %s28_s19 = sadd.s32 1, %s1663_s16  ;;  %s1667_s17 = sphi %s1706_s17, %s16_s17   ;;  %s1663_s16 = sphi %s1704_s16, %s1871_s16   ;;  %s1659_s15 = sphi %s1702_s15, %s1870_s15  }
   0x3   : > { %p30_p0 = scmp.ge.s32.totalorder %s28_s19, 2  ;;  %p1378_p1 = scmp.ge.s32.totalorder %s1667_s17, 1 }
   0x4   : > { %p163_p2 = scmp.lt.s32.totalorder %s1667_s17, 3  ;;  %p1727_p4 = scmp.eq.s32.totalorder %s1376_s18, 0 }
   0x5   : > { %s1873_s19 = smov (%p30_p0, %s28_s19), 0  ;;  %s1669_s22 = smov [#allocation5]  }
   0x6   : > { %p1723_p3 = pnand %p1378_p1, %p163_p2  ;;  %s178_s23 = sshll.u32 %s1669_s22, 4  ;;  %s179_s23 = int_to_ptr.vmem [resolvable:$true] %s178_s23 }
   0x7   : > { %s1866_s21 = scalar_select %p1727_p4, 1, 0 }
   0x8   : > { %s1865_s20 = scalar_select %p1723_p3, 1, 0 }
   0x9   : > { %p1573_p5 = pneg %p1723_p3  ;;  %s1613_s27 = scalar_lea.hbm %s1858_s1, 256 }
   0xa   : > { %p1614_p7 = scmp.ne.s32.totalorder %s1858_s1, %s1613_s27  ;;  %p1620_p11 = scmp.lt.u32.totalorder %s1613_s27, %s1858_s1 }
   0xb   : > { %p1735_p6 = pnand %p1727_p4, %p1573_p5 }
   0xd   : > { %p1615_p8 = pneg %p1735_p6 }
   0xf   : > { %p1616_p9 = pnand %p1615_p8, %p1614_p7 }
  0x11   : > { %p1617_p10 = pneg %p1616_p9 }
  0x13   : > { %p1622_p12 = pnand %p1620_p11, %p1617_p10 }
  0x15   : > { %1625 = shalt.err (!%p1622_p12)
}
  0x16   : > { %s1626_s6 = scalar_lea.vmem %s179_s23, 256  ;;  %p1634_p2 = scmp.lt.s32.totalorder %s179_s23, %s179_s23 }
  0x17   : > { %p1627_p13 = scmp.ne.s32.totalorder %s179_s23, %s1626_s6  ;;  %p1635_p5 = scmp.lt.s32.totalorder %s1626_s6, %s1626_s6 }
  0x19   : > { %p1629_p0 = pnand %p1627_p13, %p1615_p8  ;;  %p1636_p4 = por %p1635_p5, %p1634_p2 }
  0x1b   : > { %p1630_p1 = pneg %p1629_p0 }
  0x1d   : > { %p1637_p3 = pnand %p1636_p4, %p1630_p1 }
  0x1f   : > { %1640 = shalt.err (!%p1637_p3)
}
  0x20   : > { %s1670_s7 = smov 128   ;;  %s1671_s8 = smov 8  }
  0x21   : > { %1576 = dma.hbm_to_vmem [thread:$0]  (!%p1735_p6), %s1858_s1, 256, %s179_s23, [#allocation6], %s1670_s7, %s1670_s7, %s1671_s8  }
  0x22   : > { %p1868_p7 = scmp.ne.s32.totalorder %s1865_s20, 0 }
  0x23   : > { %p1869_p9 = scmp.ne.s32.totalorder (!%p1868_p7), %s1866_s21, 0 }
  0x24   : > { %207 = sbr.rel (%p1868_p7) target bundleno = 1027 (0x403), region = 32 }
  0x2b   : > { %1654 = dma.done.wait (%p1869_p9), [#allocation6], 256  }
  0x2c   : > { %1656 = vsyncadd (%p1869_p9), [#allocation6], 4294967040  ;;  %vm261_vm0 = vcmask 261120   ;;  %v1672_v0 = vmov 0.0|0.0   ;;  %vm1673_vm1 = vmmov 0   ;;  %v1674_v1 = vmov 0.0  }
  0x2d   : > { %1517 = vmatprep.subr.bf16.mxu0 %v1672_v0  ;;  %1441 = vmatprep.mubr.msk.f32.mxu0 %vm1673_vm1, %v1674_v1  ;;  %262 = vst.msk [vmem:[#allocation4] sm:$0xff] %vm261_vm0, %v1674_v1  ;;  %p238_p3 = scmp.lt.s32.totalorder %s1659_s15, 1  ;;  %v1777_v2 = vld [vmem:[#allocation5] sm:$0xff]  ;;  %v1779_v3 = vld [vmem:[#allocation5 + $0x8] sm:$0xff]  ;;  %vm258_vm2 = vcmask 7168   ;;  %v1675_v27 = vmov inf   ;;  %v743_v37 = vlaneseq }
  0x2e   : > { %1514 = vmatprep.subr.bf16.mxu1 %v1672_v0  ;;  %1434 = vmatprep.mubr.msk.f32.mxu1 %vm1673_vm1, %v1674_v1  ;;  %v271_v5 = vsel %vm261_vm0, %v1777_v2, 0  ;;  %v274_v6 = vsel %vm261_vm0, %v1779_v3, 0  ;;  %259 = vst.msk [vmem:[#allocation2] sm:$0xff] %vm258_vm2, %v1675_v27  ;;  %v1387_v31 = vld [vmem:[%s1859_s2] ss:$0 sm:$0xff]  ;;  %vm745_vm3 = vcmask 130048  }
  0x2f   : > { %s1875_s15 = smov (!%p238_p3, %s1659_s15), 1  ;;  %v277_v8 = vand.u32 4294901760, %v271_v5  ;;  %v280_v9 = vand.u32 4294901760, %v274_v6  ;;  %v1676_v36 = vmov 0   ;;  %v744_v39 = vand.u32 127, %v743_v37 }
  0x30   : > { %s1771_s11 = sshll.u32 %s1875_s15, 3  ;;  %1611 = vset.pattern.permute.xlu1 %v1676_v36  ;;  %260 = vst.msk [vmem:[#allocation3] sm:$0xff] %vm258_vm2, %v1676_v36  ;;  %1612 = vset.pattern.permute.xlu0 %v1676_v36  ;;  %v773_v51 = vand.u32 4294901760, %v1777_v2  ;;  %v776_v52 = vand.u32 4294901760, %v1779_v3 }
  0x31   : > { %s241_s14 = scalar_lea.vmem %s1857_s0, %s1771_s11  ;;  %v355_v11 = vsub.f32 %v271_v5, %v277_v8  ;;  %v362_v12 = vsub.f32 %v274_v6, %v280_v9  ;;  %v1515_v14 = vpack.c.bf16 %v280_v9, %v277_v8  ;;  %s253_s22 = scalar_lea.vmem %s1861_s4, %s1771_s11 }
  0x32   : > { %v263_v4 = vld [vmem:[%s241_s14] sm:$0xff]  ;;  %v1533_v53 = vpack.c.bf16 %v776_v52, %v773_v51  ;;  %v851_v54 = vsub.f32 %v1777_v2, %v773_v51  ;;  %v858_v55 = vsub.f32 %v1779_v3, %v776_v52  ;;  %s249_s25 = scalar_lea.vmem %s1860_s3, %s1771_s11 }
  0x33   : > { %v268_v7 = vsel %vm261_vm0, %v263_v4, 0  ;;  %v356_v15 = vand.u32 4294901760, %v355_v11  ;;  %v363_v16 = vand.u32 4294901760, %v362_v12  ;;  %1516 = vmatpush3.bf16.xpose.msra.mxu1 %v1515_v14  ;;  %v1521_v25 = vpack.c.bf16 %v362_v12, %v355_v11 }
  0x34   : > { %v343_v10 = vand.u32 4294901760, %v268_v7  ;;  %1532 = vmatprep.subr.bf16.mxu1 %v1672_v0  ;;  %v852_v56 = vand.u32 4294901760, %v851_v54  ;;  %v859_v57 = vand.u32 4294901760, %v858_v55  ;;  %v1539_v63 = vpack.c.bf16 %v858_v55, %v851_v54 }
  0x35   : > { %v357_v18 = vsub.f32 %v355_v11, %v356_v15  ;;  %v364_v19 = vsub.f32 %v362_v12, %v363_v16  ;;  %v1527_v26 = vpack.c.bf16 %v363_v16, %v356_v15  ;;  %v1231_v38 = vld [vmem:[#allocation2] sm:$0xff] }
  0x36   : > { %v344_v13 = vsub.f32 %v268_v7, %v343_v10  ;;  %v853_v58 = vsub.f32 %v851_v54, %v852_v56  ;;  %v860_v59 = vsub.f32 %v858_v55, %v859_v57  ;;  %v1545_v4 = vpack.c.bf16 %v859_v57, %v852_v56 }
  0x37   : > { %v358_v21 = vand.u32 4294901760, %v357_v18  ;;  %v365_v22 = vand.u32 4294901760, %v364_v19  ;;  %v1239_v2 = vld [vmem:[#allocation3] sm:$0xff]  ;;  %v1242_v18 = vld [vmem:[#allocation4] sm:$0xff] }
  0x38   : > { %v345_v17 = vand.u32 4294901760, %v344_v13  ;;  %v854_v60 = vand.u32 4294901760, %v853_v58  ;;  %v861_v61 = vand.u32 4294901760, %v860_v59 }
  0x39   : > { %v1518_v24 = vpack.c.bf16 %v365_v22, %v358_v21 }
  0x3a   : > { %v346_v20 = vsub.f32 %v344_v13, %v345_v17  ;;  %v1536_v62 = vpack.c.bf16 %v861_v61, %v854_v60 }
  0x3b   : > { %1519 = vmatpush3.bf16.xpose.msra.mxu0 %v1518_v24 }
  0x3c   : > { %v347_v23 = vand.u32 4294901760, %v346_v20  ;;  %1520 = vmatprep.subr.bf16.mxu0 %v1672_v0 }
  0x3e   : > { %1435 = vmatmul.mubr.f32.vlgmr.msra.gmra.mrb[0].mxu1 %v347_v23 }
  0x3f   : > { %1476 = vmatprep.mubr.msk.f32.mxu1 %vm1673_vm1, %v1674_v1  ;;  %1534 = vmatpush3.bf16.msra.mxu1 %v1533_v53 }
  0x40   : > { %1535 = vmatprep.subr.bf16.mxu1 %v1672_v0 }
  0x42   : > { %1442 = vmatmul.mubr.f32.vlgmr.msra.gmra.mrb[0].mxu0 %v343_v10 }
  0x43   : > { %1522 = vmatpush3.bf16.xpose.msra.mxu0 %v1521_v25  ;;  %1448 = vmatprep.mubr.msk.f32.mxu0 %vm1673_vm1, %v1674_v1 }
  0x44   : > { %1523 = vmatprep.subr.bf16.mxu0 %v1672_v0 }
  0x4a   : > { %1449 = vmatmul.mubr.f32.vlgmr.msra.gmra.mrb[0].mxu0 %v344_v13 }
  0x4b   : > { %1525 = vmatpush3.bf16.xpose.msra.mxu0 %v1515_v14  ;;  %1455 = vmatprep.mubr.msk.f32.mxu0 %vm1673_vm1, %v1674_v1 }
  0x4c   : > { %1526 = vmatprep.subr.bf16.mxu0 %v1672_v0 }
  0x52   : > { %1456 = vmatmul.mubr.f32.vlgmr.msra.gmra.mrb[0].mxu0 %v345_v17 }
  0x53   : > { %1528 = vmatpush3.bf16.xpose.msra.mxu0 %v1527_v26  ;;  %1462 = vmatprep.mubr.msk.f32.mxu0 %vm1673_vm1, %v1674_v1 }
  0x54   : > { %1529 = vmatprep.subr.bf16.mxu0 %v1672_v0 }
  0x5a   : > { %1463 = vmatmul.mubr.f32.vlgmr.msra.gmra.mrb[0].mxu0 %v343_v10 }
  0x5b   : > { %1531 = vmatpush3.bf16.xpose.msra.mxu0 %v1515_v14  ;;  %1469 = vmatprep.mubr.msk.f32.mxu0 %vm1673_vm1, %v1674_v1 }
  0x62   : > { %1470 = vmatmul.mubr.f32.vlgmr.msra.gmra.mrb[0].mxu0 %v343_v10 }
 0x111   : > { %v349_v28 = vpop.f32.mrb[0].mxu1 }
 0x112   : > { %v1436_v29 = vpop.f32.mrb[1].mxu1 }
 0x135   : > { %v731_v30 = vpop.f32.mrb[0].mxu0 }
 0x136   : > { %v1550_v32 = vadd.f32 %v731_v30, %v349_v28  ;;  %v1471_v33 = vpop.f32.mrb[1].mxu0 }
 0x138   : > { %v742_v34 = vsub.f32 %v1387_v31, %v1550_v32 }
 0x13a   : > { %v746_v35 = vsel %vm745_vm3, %v742_v34, inf }
 0x13b   : > { %747 = vmin.xlane.f32.xlu0 %v746_v35 }
 0x1c8   : > { %v748_v40 = vpop.xlane.xlu0 %747 }
 0x1c9   : > { %vm749_vm4 = vcmp.eq.f32.partialorder %v742_v34, %v748_v40  ;;  %vm1232_vm5 = vcmp.lt.f32.partialorder %v748_v40, %v1231_v38 }
 0x1ca   : > { %v1233_v41 = vsel %vm1232_vm5, %v748_v40, %v1231_v38  ;;  %v750_v42 = vsel %vm749_vm4, %v744_v39, 16  ;;  %v1243_v50 = vsel %vm1232_vm5, 1, %v1676_v36 }
 0x1cb   : > { %1235 = vst.msk [vmem:[#allocation2] sm:$0xff] %vm258_vm2, %v1233_v41  ;;  %v751_v43 = vsel %vm745_vm3, %v750_v42, 2147483647 }
 0x1cc   : > { %v753_v44 = vshra.s32 %v751_v43, 16  ;;  %v752_v46 = vand.u32 65535, %v751_v43 }
 0x1ce   : > { %v755_v45 = vcvt.s32.f32 %v753_v44  ;;  %v754_v48 = vcvt.s32.f32 %v752_v46 }
 0x1d0   : > { %756 = vmin.xlane.f32.xlu0 %v755_v45 }
 0x25d   : > { %v757_v47 = vpop.xlane.xlu0 %756 }
 0x25e   : > { %vm758_vm6 = vcmp.eq.f32.partialorder %v755_v45, %v757_v47  ;;  %v763_v5 = vcvt.f32.s32 %v757_v47 }
 0x25f   : > { %v759_v49 = vsel %vm758_vm6, %v754_v48, inf }
 0x260   : > { %760 = vmin.xlane.f32.xlu1 %v759_v49  ;;  %v764_v7 = vshll.u32 %v763_v5, 16 }
 0x271   : > { %1245 = vperm.xlu1 %1611, %v1243_v50  }
 0x2ed   : > { %v761_v6 = vpop.xlane.xlu1 %760 }
 0x2ee   : > { %v762_v8 = vcvt.f32.s32 %v761_v6 }
 0x2f0   : > { %v765_v9 = vadd.s32 %v764_v7, %v762_v8 }
 0x2f1   : > { %v1246_v17 = vpop.permute.xlu1 %1245 }
 0x2f2   : > { %vm766_vm7 = vcmp.eq.s32.totalorder %v744_v39, %v765_v9  ;;  %v1240_v3 = vsel %vm1232_vm5, %v765_v9, %v1239_v2  ;;  %vm1247_vm8 = vcmp.eq.s32.totalorder %v1246_v17, 1 }
 0x2f3   : > { %v1388_v10 = vsel %vm766_vm7, 1.0, %v1674_v1  ;;  %1241 = vst.msk [vmem:[#allocation3] sm:$0xff] %vm258_vm2, %v1240_v3 }
 0x2f4   : > { %v770_v11 = vsel %vm745_vm3, %v1388_v10, 0 }
 0x2f5   : > { %v840_v12 = vsub.f32 %v770_v11, %v770_v11 }
 0x2f7   : > { %v841_v13 = vand.u32 4294901760, %v840_v12 }
 0x2f9   : > { %v842_v14 = vsub.f32 %v840_v12, %v841_v13 }
 0x2fa   : > { %v1255_v15 = vld [vmem:[#allocation3] sm:$0xff] }
 0x2fb   : > { %1256 = vst.msk [vmem:[%s253_s22] sm:$0xff] %vm258_vm2, %v1255_v15  ;;  %v843_v16 = vand.u32 4294901760, %v842_v14 }
 0x2fd   : > { %1477 = vmatmul.mubr.f32.vlgmr.msra.gmra.mrb[2].mxu1 %v843_v16 }
 0x2fe   : > { %1537 = vmatpush3.bf16.msra.mxu1 %v1536_v62  ;;  %1483 = vmatprep.mubr.msk.f32.mxu1 %vm1673_vm1, %v1674_v1 }
 0x2ff   : > { %1538 = vmatprep.subr.bf16.mxu1 %v1672_v0 }
 0x305   : > { %1484 = vmatmul.mubr.msk.f32.vlgmr.msra.gmra.mrb[2].mxu1 %vm745_vm3, %v1388_v10 }
 0x306   : > { %1540 = vmatpush3.bf16.msra.mxu1 %v1539_v63  ;;  %1490 = vmatprep.mubr.msk.f32.mxu1 %vm1673_vm1, %v1674_v1 }
 0x307   : > { %1541 = vmatprep.subr.bf16.mxu1 %v1672_v0 }
 0x30d   : > { %1491 = vmatmul.mubr.f32.vlgmr.msra.gmra.mrb[2].mxu1 %v840_v12 }
 0x30e   : > { %1543 = vmatpush3.bf16.msra.mxu1 %v1533_v53  ;;  %1497 = vmatprep.mubr.msk.f32.mxu1 %vm1673_vm1, %v1674_v1 }
 0x30f   : > { %1544 = vmatprep.subr.bf16.mxu1 %v1672_v0 }
 0x315   : > { %1498 = vmatmul.mubr.f32.vlgmr.msra.gmra.mrb[2].mxu1 %v841_v13 }
 0x316   : > { %1546 = vmatpush3.bf16.msra.mxu1 %v1545_v4  ;;  %1504 = vmatprep.mubr.msk.f32.mxu1 %vm1673_vm1, %v1674_v1 }
 0x317   : > { %1547 = vmatprep.subr.bf16.mxu1 %v1672_v0 }
 0x31d   : > { %1505 = vmatmul.mubr.msk.f32.vlgmr.msra.gmra.mrb[2].mxu1 %vm745_vm3, %v1388_v10 }
 0x31e   : > { %1549 = vmatpush3.bf16.msra.mxu1 %v1533_v53  ;;  %1511 = vmatprep.mubr.msk.f32.mxu1 %vm1673_vm1, %v1674_v1 }
 0x325   : > { %1512 = vmatmul.mubr.msk.f32.vlgmr.msra.gmra.mrb[2].mxu1 %vm745_vm3, %v1388_v10 }
 0x3f8   : > { %v1227_v19 = vpop.f32.mrb[2].mxu1 }
 0x3f9   : > { %v1248_v20 = vsel %vm1247_vm8, %v1227_v19, %v1242_v18  ;;  %v1513_v21 = vpop.f32.mrb[3].mxu1 }
 0x3fa   : > { %1249 = vst.msk [vmem:[#allocation4] sm:$0xff] %vm261_vm0, %v1248_v20 }
 0x401   : > { %v1253_v0 = vld [vmem:[#allocation4] sm:$0xff] }
 0x402   : > { %1254 = vst.msk [vmem:[%s249_s25] sm:$0xff] %vm261_vm0, %v1253_v0 }
 0x403 PF: > { %s16_s17 = sadd.s32 1, %s1667_s17   ;;  %s1870_s15 = smov %s1663_s16 }
 0x404   : > { %p13_p4 = scmp.ge.s32.totalorder %s16_s17, 4   ;;  %s1871_s16 = smov %s1873_s19 }
 0x406   :  { %15 = sbr.rel (!%p13_p4) target bundleno = 2 (0x2), region = 91 }
 0x40d   :  { %1290 = vsyncpa [#allocation6], 1 }
 0x40e   :  { %1292 = vsyncpa [#allocation6 + $0x1], 1 }

</bundles_post_ra>
